<compile_context>
chip_gen: v7x
topology: tpu7x:2x2x1
jax: 0.10.0
libtpu: 0.0.40
codegen_flags: <defaults>
</compile_context>

<pallas_src>
import functools
import math

import jax
import jax.numpy as jnp
from jax.experimental import pallas as pl
from jax.experimental.pallas import tpu as pltpu


# ----------------------------------------------------------------------------
# Kernel
# ----------------------------------------------------------------------------
def _liquid_kernel(x_ref, wi_ref, wh_ref, inv_tau_ref, h_ref, u_ref,
                   *, n_streams, mxu_dtype):
    n_t, tb, in_dim = x_ref.shape        # time-major slab (Tc, tb, I)
    hidden = wh_ref.shape[1]             # padded hidden size (multiple of 128)
    c = pl.program_id(1)                 # time-chunk index (sequential)

    @pl.when(c == 0)
    def _():
        h_ref[...] = jnp.zeros_like(h_ref)

    # Hoisted input projection for the whole chunk: one (Tc*tb, I) @ (I, H)
    # MXU matmul instead of Tc tiny M=tb matmuls. Result is staged time-major
    # in VMEM scratch; both reshapes are free because tb % 8 == 0.
    x2 = x_ref[...].reshape(n_t * tb, in_dim)
    u2 = jnp.dot(x2, wi_ref[...], preferred_element_type=jnp.float32)
    u_ref[...] = u2.reshape(n_t, tb, hidden)          # (Tc, tb, H) f32 scratch

    wh = wh_ref[...]                     # (H, H), VMEM-resident, mxu_dtype
    inv_tau = inv_tau_ref[...]           # (1, H), f32, broadcast over rows

    # Recurrence: split the batch tile into independent row-group streams so
    # stream A's tanh (EUP) overlaps stream B's h @ Wh (MXU) within a step.
    rows = tb // n_streams
    hs = [h_ref[s * rows:(s + 1) * rows, :] for s in range(n_streams)]
    for i in range(n_t):                               # static unroll
        u_i = u_ref[i]                                 # contiguous (tb, H) load
        rs = [jnp.dot(hs[s].astype(mxu_dtype), wh,
                      preferred_element_type=jnp.float32)
              for s in range(n_streams)]
        for s in range(n_streams):
            pre = u_i[s * rows:(s + 1) * rows, :] + rs[s]
            # NOTE: multiply by precomputed 1/tau (one extra rounding vs the
            # reference division; exact for tau == 1). Elementwise math is f32.
            hs[s] = hs[s] + (jnp.tanh(pre) - hs[s]) * inv_tau
    for s in range(n_streams):
        h_ref[s * rows:(s + 1) * rows, :] = hs[s]


# ----------------------------------------------------------------------------
# Wrapper helpers
# ----------------------------------------------------------------------------
def _round_up(n, m):
    return ((n + m - 1) // m) * m


def _device_kind():
    try:
        return jax.devices()[0].device_kind.lower()
    except Exception:
        return ""


def _num_tensorcores():
    # Only v7x has 2 TensorCores per device worth sharding the batch over; on
    # single-TC v5e/v6e a 2-way split just serializes the recurrence twice.
    return 2 if "v7" in _device_kind() else 1


def _vmem_capacity_bytes():
    try:
        return int(pltpu.get_tpu_info().vmem_capacity_bytes)
    except Exception:
        return 64 << 20   # conservative fallback (v7x per-TC VMEM)


def _choose_time_chunk(T, footprint, budget, cap=128):
    """Largest time chunk (divisor of T, <= cap) whose VMEM footprint fits."""
    best = 1
    for tc in range(1, min(cap, T) + 1):
        if T % tc == 0 and footprint(tc) <= budget:
            best = tc
    return best


# ----------------------------------------------------------------------------
# Public entry point
# ----------------------------------------------------------------------------
def liquid_neuron_forward(x, input_weight, hidden_weight, time_constant,
                          *, mxu_dtype=jnp.bfloat16):
    """x: (B, T, I) f32 -> h: (B, H) f32. Matches LiquidNeuron.forward.

    mxu_dtype controls the matmul-operand precision only (bf16 is the native
    MXU dtype on v5e/v6e/v7x); accumulation, tanh and the state update stay f32.
    """
    x = x.astype(jnp.float32)
    B, T, I = x.shape
    H = hidden_weight.shape[0]
    if T == 0:
        return jnp.zeros((B, H), jnp.float32)

    # --- padding: lane-dense H (mult of 128), sublane-dense B (mult of 8) ---
    Hp = _round_up(H, 128)
    Bp = _round_up(B, 8)
    f32 = jnp.float32
    wi = jnp.pad(input_weight.astype(f32), ((0, 0), (0, Hp - H)))
    wh = jnp.pad(hidden_weight.astype(f32), ((0, Hp - H), (0, Hp - H)))
    # pad 1/tau with 1.0 so padded hidden lanes stay exactly zero
    inv_tau = jnp.pad((1.0 / time_constant.astype(f32)).reshape(1, H),
                      ((0, 0), (0, Hp - H)), constant_values=1.0)
    wi = wi.astype(mxu_dtype)
    wh = wh.astype(mxu_dtype)
    # time-major x: pad + transpose fuse into one XLA copy; bf16 halves the
    # streamed HBM bytes when mxu_dtype is bf16.
    xp = jnp.transpose(jnp.pad(x, ((0, Bp - B), (0, 0), (0, 0))),
                       (1, 0, 2)).astype(mxu_dtype)          # (T, Bp, I)

    # --- generation-aware batch tiling --------------------------------------
    if _num_tensorcores() >= 2 and Bp % 16 == 0:
        b_tile = Bp // 2          # 2-way split only where there are 2 TCs
    else:
        b_tile = Bp
    n_streams = 2 if (b_tile >= 16 and b_tile % 16 == 0) else 1

    # --- VMEM-aware time chunk + explicit vmem limit -------------------------
    w_bytes = jnp.dtype(mxu_dtype).itemsize
    capacity = _vmem_capacity_bytes()

    def footprint(tc):
        weights = (I * Hp + Hp * Hp) * w_bytes + Hp * 4   # single-buffered
        x_slab = 2 * b_tile * tc * I * w_bytes            # double-buffered in
        u_scr = tc * b_tile * Hp * 4                      # time-major scratch
        out = 2 * b_tile * Hp * 4                         # resident h block
        return weights + x_slab + u_scr + out

    t_chunk = _choose_time_chunk(T, footprint, budget=capacity // 2)
    vmem_limit = int(min(max(2 * footprint(t_chunk) + (8 << 20), 32 << 20),
                         capacity - (4 << 20)))

    kernel = functools.partial(_liquid_kernel, n_streams=n_streams,
                               mxu_dtype=mxu_dtype)

    grid_spec = pltpu.PrefetchScalarGridSpec(
        num_scalar_prefetch=0,
        grid=(Bp // b_tile, T // t_chunk),
        in_specs=[
            # streamed time-major input slab: (Tc, tb, I) per grid step
            pl.BlockSpec((t_chunk, b_tile, I), lambda b, c: (c, b, 0)),
            # VMEM-resident weights / 1/tau: constant block, single-buffered
            pl.BlockSpec((I, Hp), lambda b, c: (0, 0),
                         pipeline_mode=pl.Buffered(1)),
            pl.BlockSpec((Hp, Hp), lambda b, c: (0, 0),
                         pipeline_mode=pl.Buffered(1)),
            pl.BlockSpec((1, Hp), lambda b, c: (0, 0),
                         pipeline_mode=pl.Buffered(1)),
        ],
        # constant block index along the time axis -> VMEM-resident accumulator
        out_specs=pl.BlockSpec((b_tile, Hp), lambda b, c: (b, 0)),
        scratch_shapes=[pltpu.VMEM((t_chunk, b_tile, Hp), jnp.float32)],
    )

    h_pad = pl.pallas_call(
        kernel,
        out_shape=jax.ShapeDtypeStruct((Bp, Hp), jnp.float32),
        grid_spec=grid_spec,
        compiler_params=pltpu.CompilerParams(
            dimension_semantics=("parallel", "arbitrary"),
            vmem_limit_bytes=vmem_limit),
    )(xp, wi, wh, inv_tau)
    return h_pad[:B, :H]


# ----------------------------------------------------------------------------
# Reference + synthetic init
# ----------------------------------------------------------------------------
def _init_params(key, input_size, hidden_size):
    """Deterministic synthetic init matching LiquidNeuron.reset_parameters."""
    k_wi, k_wh = jax.random.split(key)
    bound = math.sqrt(6.0 / (input_size + hidden_size))        # xavier_uniform_
    wi = jax.random.uniform(k_wi, (input_size, hidden_size), jnp.float32,
                            minval=-bound, maxval=bound)
    a = jax.random.normal(k_wh, (hidden_size, hidden_size), jnp.float32)
    q, r = jnp.linalg.qr(a)                                     # orthogonal_
    wh = q * jnp.sign(jnp.diag(r))[None, :]
    tau = jnp.ones((hidden_size,), jnp.float32)
    return wi, wh, tau


def _reference_forward(x, wi, wh, tau, *, mxu_dtype=jnp.float32):
    """Pure-JAX reference (optionally with kernel-matched bf16 MXU operands)."""
    B, T, _ = x.shape
    H = wh.shape[0]
    hp = jax.lax.Precision.HIGHEST
    h = jnp.zeros((B, H), jnp.float32)
    for t in range(T):
        u = jnp.dot(x[:, t, :].astype(mxu_dtype), wi.astype(mxu_dtype),
                    preferred_element_type=jnp.float32, precision=hp)
        r = jnp.dot(h.astype(mxu_dtype), wh.astype(mxu_dtype),
                    preferred_element_type=jnp.float32, precision=hp)
        h = h + (jnp.tanh(u + r) - h) / tau
    return h


if __name__ == "__main__":
    B, T, I, H = 2, 8, 16, 32
    key = jax.random.PRNGKey(0)
    k_x, k_p = jax.random.split(key)

    x = jax.random.normal(k_x, (B, T, I), jnp.float32)
    wi, wh, tau = _init_params(k_p, I, H)

    # f32-MXU path: checked tightly against the f32 reference.
    h_f32 = liquid_neuron_forward(x, wi, wh, tau, mxu_dtype=jnp.float32)
    jax.block_until_ready(h_f32)
    ref_f32 = _reference_forward(x, wi, wh, tau)
    assert h_f32.shape == (B, H)
    assert bool(jnp.allclose(h_f32, ref_f32, atol=1e-4, rtol=1e-4)), \
        float(jnp.max(jnp.abs(h_f32 - ref_f32)))

    # Default bf16-MXU path (native MXU dtype): elementwise math stays f32,
    # so it matches a bf16-operand reference tightly and the f32 reference
    # to bf16-level accuracy.
    h_bf16 = liquid_neuron_forward(x, wi, wh, tau)
    jax.block_until_ready(h_bf16)
    ref_bf16 = _reference_forward(x, wi, wh, tau, mxu_dtype=jnp.bfloat16)
    assert bool(jnp.allclose(h_bf16, ref_bf16, atol=1e-3, rtol=1e-3)), \
        float(jnp.max(jnp.abs(h_bf16 - ref_bf16)))
    assert bool(jnp.allclose(h_bf16, ref_f32, atol=1e-1, rtol=1e-1))

    print("KERNEL_OK")
</pallas_src>

<mosaic_0001>
module attributes {stable_mosaic.version = 11 : i64} {
  func.func @_liquid_kernel(%arg0: i32, %arg1: i32, %arg2: memref<8x8x16xf32, #tpu.memory_space<vmem>>, %arg3: memref<16x128xf32, #tpu.memory_space<vmem>>, %arg4: memref<128x128xf32, #tpu.memory_space<vmem>>, %arg5: memref<1x128xf32, #tpu.memory_space<vmem>>, %arg6: memref<8x128xf32, #tpu.memory_space<vmem>>, %arg7: memref<8x8x128xf32, #tpu.memory_space<vmem>>) attributes {dimension_semantics = [#tpu.dimension_semantics<parallel>, #tpu.dimension_semantics<arbitrary>], iteration_bounds = array<i64: 1, 1>, scalar_prefetch = 0 : i64, scratch_operands = 1 : i64, tpu.core_type = #tpu.core_type<tc>, window_params = [{transform_indices = @transform_0, window_bounds = array<i64: 8, 8, 16>}, {pipeline_mode = #tpu.pipeline_mode<synchronous>, transform_indices = @transform_1, window_bounds = array<i64: 16, 128>}, {pipeline_mode = #tpu.pipeline_mode<synchronous>, transform_indices = @transform_2, window_bounds = array<i64: 128, 128>}, {pipeline_mode = #tpu.pipeline_mode<synchronous>, transform_indices = @transform_3, window_bounds = array<i64: 1, 128>}, {transform_indices = @transform_4, window_bounds = array<i64: 8, 128>}]} {
    %c0_i32 = arith.constant 0 : i32
    %0 = arith.cmpi eq, %arg1, %c0_i32 : i32
    %1 = arith.extui %0 : i1 to i32
    %c0_i32_0 = arith.constant 0 : i32
    %2 = arith.cmpi ne, %1, %c0_i32_0 : i32
    scf.if %2 {
      %cst_41 = arith.constant 0.000000e+00 : f32
      %85 = vector.broadcast %cst_41 : f32 to vector<8x128xf32>
      %c0_42 = arith.constant 0 : index
      %c0_43 = arith.constant 0 : index
      %86 = vector.load %arg6[%c0_42, %c0_43] : memref<8x128xf32, #tpu.memory_space<vmem>>, vector<8x128xf32>
      tpu.vector_store %arg6[%c0_42, %c0_43], %85 {strides = array<i32>} : memref<8x128xf32, #tpu.memory_space<vmem>>, vector<8x128xf32>,
    } else {
    }
    %c0 = arith.constant 0 : index
    %c0_1 = arith.constant 0 : index
    %c0_2 = arith.constant 0 : index
    %3 = vector.load %arg2[%c0, %c0_1, %c0_2] : memref<8x8x16xf32, #tpu.memory_space<vmem>>, vector<8x8x16xf32>
    %4 = vector.shape_cast %3 : vector<8x8x16xf32> to vector<64x16xf32>
    %c0_3 = arith.constant 0 : index
    %c0_4 = arith.constant 0 : index
    %5 = vector.load %arg3[%c0_3, %c0_4] : memref<16x128xf32, #tpu.memory_space<vmem>>, vector<16x128xf32>
    %cst = arith.constant dense<0.000000e+00> : vector<64x128xf32>
    %6 = tpu.matmul %4, %5, %cst {dimension_numbers = #tpu.dot_dimension_numbers<[1], [0], [0], [1], [0, 0, 1, 1], [], []>} : vector<64x16xf32>, vector<16x128xf32>, vector<64x128xf32> -> vector<64x128xf32>
    %7 = vector.shape_cast %6 : vector<64x128xf32> to vector<8x8x128xf32>
    %c0_5 = arith.constant 0 : index
    %c0_6 = arith.constant 0 : index
    %c0_7 = arith.constant 0 : index
    %8 = vector.load %arg7[%c0_5, %c0_6, %c0_7] : memref<8x8x128xf32, #tpu.memory_space<vmem>>, vector<8x8x128xf32>
    tpu.vector_store %arg7[%c0_5, %c0_6, %c0_7], %7 {strides = array<i32>} : memref<8x8x128xf32, #tpu.memory_space<vmem>>, vector<8x8x128xf32>,
    %c0_8 = arith.constant 0 : index
    %c0_9 = arith.constant 0 : index
    %9 = vector.load %arg4[%c0_8, %c0_9] : memref<128x128xf32, #tpu.memory_space<vmem>>, vector<128x128xf32>
    %c0_10 = arith.constant 0 : index
    %c0_11 = arith.constant 0 : index
    %10 = vector.load %arg5[%c0_10, %c0_11] : memref<1x128xf32, #tpu.memory_space<vmem>>, vector<1x128xf32>
    %c0_12 = arith.constant 0 : index
    %c0_13 = arith.constant 0 : index
    %11 = vector.load %arg6[%c0_12, %c0_13] : memref<8x128xf32, #tpu.memory_space<vmem>>, vector<8x128xf32>
    %c0_14 = arith.constant 0 : index
    %c0_15 = arith.constant 0 : index
    %c0_16 = arith.constant 0 : index
    %12 = vector.load %arg7[%c0_14, %c0_15, %c0_16] : memref<8x8x128xf32, #tpu.memory_space<vmem>>, vector<1x8x128xf32>
    %13 = vector.shape_cast %12 : vector<1x8x128xf32> to vector<8x128xf32>
    %cst_17 = arith.constant dense<0.000000e+00> : vector<8x128xf32>
    %14 = tpu.matmul %11, %9, %cst_17 {dimension_numbers = #tpu.dot_dimension_numbers<[1], [0], [0], [1], [0, 0, 1, 1], [], []>} : vector<8x128xf32>, vector<128x128xf32>, vector<8x128xf32> -> vector<8x128xf32>
    %15 = arith.addf %13, %14 : vector<8x128xf32>
    %16 = math.tanh %15 : vector<8x128xf32>
    %17 = arith.subf %16, %11 : vector<8x128xf32>
    %18 = vector.broadcast %10 : vector<1x128xf32> to vector<8x128xf32>
    %19 = arith.mulf %17, %18 : vector<8x128xf32>
    %20 = arith.addf %11, %19 : vector<8x128xf32>
    %c1 = arith.constant 1 : index
    %c0_18 = arith.constant 0 : index
    %c0_19 = arith.constant 0 : index
    %21 = vector.load %arg7[%c1, %c0_18, %c0_19] : memref<8x8x128xf32, #tpu.memory_space<vmem>>, vector<1x8x128xf32>
    %22 = vector.shape_cast %21 : vector<1x8x128xf32> to vector<8x128xf32>
    %cst_20 = arith.constant dense<0.000000e+00> : vector<8x128xf32>
    %23 = tpu.matmul %20, %9, %cst_20 {dimension_numbers = #tpu.dot_dimension_numbers<[1], [0], [0], [1], [0, 0, 1, 1], [], []>} : vector<8x128xf32>, vector<128x128xf32>, vector<8x128xf32> -> vector<8x128xf32>
    %24 = arith.addf %22, %23 : vector<8x128xf32>
    %25 = math.tanh %24 : vector<8x128xf32>
    %26 = arith.subf %25, %20 : vector<8x128xf32>
    %27 = vector.broadcast %10 : vector<1x128xf32> to vector<8x128xf32>
    %28 = arith.mulf %26, %27 : vector<8x128xf32>
    %29 = arith.addf %20, %28 : vector<8x128xf32>
    %c2 = arith.constant 2 : index
    %c0_21 = arith.constant 0 : index
    %c0_22 = arith.constant 0 : index
    %30 = vector.load %arg7[%c2, %c0_21, %c0_22] : memref<8x8x128xf32, #tpu.memory_space<vmem>>, vector<1x8x128xf32>
    %31 = vector.shape_cast %30 : vector<1x8x128xf32> to vector<8x128xf32>
    %cst_23 = arith.constant dense<0.000000e+00> : vector<8x128xf32>
    %32 = tpu.matmul %29, %9, %cst_23 {dimension_numbers = #tpu.dot_dimension_numbers<[1], [0], [0], [1], [0, 0, 1, 1], [], []>} : vector<8x128xf32>, vector<128x128xf32>, vector<8x128xf32> -> vector<8x128xf32>
    %33 = arith.addf %31, %32 : vector<8x128xf32>
    %34 = math.tanh %33 : vector<8x128xf32>
    %35 = arith.subf %34, %29 : vector<8x128xf32>
    %36 = vector.broadcast %10 : vector<1x128xf32> to vector<8x128xf32>
    %37 = arith.mulf %35, %36 : vector<8x128xf32>
    %38 = arith.addf %29, %37 : vector<8x128xf32>
    %c3 = arith.constant 3 : index
    %c0_24 = arith.constant 0 : index
    %c0_25 = arith.constant 0 : index
    %39 = vector.load %arg7[%c3, %c0_24, %c0_25] : memref<8x8x128xf32, #tpu.memory_space<vmem>>, vector<1x8x128xf32>
    %40 = vector.shape_cast %39 : vector<1x8x128xf32> to vector<8x128xf32>
    %cst_26 = arith.constant dense<0.000000e+00> : vector<8x128xf32>
    %41 = tpu.matmul %38, %9, %cst_26 {dimension_numbers = #tpu.dot_dimension_numbers<[1], [0], [0], [1], [0, 0, 1, 1], [], []>} : vector<8x128xf32>, vector<128x128xf32>, vector<8x128xf32> -> vector<8x128xf32>
    %42 = arith.addf %40, %41 : vector<8x128xf32>
    %43 = math.tanh %42 : vector<8x128xf32>
    %44 = arith.subf %43, %38 : vector<8x128xf32>
    %45 = vector.broadcast %10 : vector<1x128xf32> to vector<8x128xf32>
    %46 = arith.mulf %44, %45 : vector<8x128xf32>
    %47 = arith.addf %38, %46 : vector<8x128xf32>
    %c4 = arith.constant 4 : index
    %c0_27 = arith.constant 0 : index
    %c0_28 = arith.constant 0 : index
    %48 = vector.load %arg7[%c4, %c0_27, %c0_28] : memref<8x8x128xf32, #tpu.memory_space<vmem>>, vector<1x8x128xf32>
    %49 = vector.shape_cast %48 : vector<1x8x128xf32> to vector<8x128xf32>
    %cst_29 = arith.constant dense<0.000000e+00> : vector<8x128xf32>
    %50 = tpu.matmul %47, %9, %cst_29 {dimension_numbers = #tpu.dot_dimension_numbers<[1], [0], [0], [1], [0, 0, 1, 1], [], []>} : vector<8x128xf32>, vector<128x128xf32>, vector<8x128xf32> -> vector<8x128xf32>
    %51 = arith.addf %49, %50 : vector<8x128xf32>
    %52 = math.tanh %51 : vector<8x128xf32>
    %53 = arith.subf %52, %47 : vector<8x128xf32>
    %54 = vector.broadcast %10 : vector<1x128xf32> to vector<8x128xf32>
    %55 = arith.mulf %53, %54 : vector<8x128xf32>
    %56 = arith.addf %47, %55 : vector<8x128xf32>
    %c5 = arith.constant 5 : index
    %c0_30 = arith.constant 0 : index
    %c0_31 = arith.constant 0 : index
    %57 = vector.load %arg7[%c5, %c0_30, %c0_31] : memref<8x8x128xf32, #tpu.memory_space<vmem>>, vector<1x8x128xf32>
    %58 = vector.shape_cast %57 : vector<1x8x128xf32> to vector<8x128xf32>
    %cst_32 = arith.constant dense<0.000000e+00> : vector<8x128xf32>
    %59 = tpu.matmul %56, %9, %cst_32 {dimension_numbers = #tpu.dot_dimension_numbers<[1], [0], [0], [1], [0, 0, 1, 1], [], []>} : vector<8x128xf32>, vector<128x128xf32>, vector<8x128xf32> -> vector<8x128xf32>
    %60 = arith.addf %58, %59 : vector<8x128xf32>
    %61 = math.tanh %60 : vector<8x128xf32>
    %62 = arith.subf %61, %56 : vector<8x128xf32>
    %63 = vector.broadcast %10 : vector<1x128xf32> to vector<8x128xf32>
    %64 = arith.mulf %62, %63 : vector<8x128xf32>
    %65 = arith.addf %56, %64 : vector<8x128xf32>
    %c6 = arith.constant 6 : index
    %c0_33 = arith.constant 0 : index
    %c0_34 = arith.constant 0 : index
    %66 = vector.load %arg7[%c6, %c0_33, %c0_34] : memref<8x8x128xf32, #tpu.memory_space<vmem>>, vector<1x8x128xf32>
    %67 = vector.shape_cast %66 : vector<1x8x128xf32> to vector<8x128xf32>
    %cst_35 = arith.constant dense<0.000000e+00> : vector<8x128xf32>
    %68 = tpu.matmul %65, %9, %cst_35 {dimension_numbers = #tpu.dot_dimension_numbers<[1], [0], [0], [1], [0, 0, 1, 1], [], []>} : vector<8x128xf32>, vector<128x128xf32>, vector<8x128xf32> -> vector<8x128xf32>
    %69 = arith.addf %67, %68 : vector<8x128xf32>
    %70 = math.tanh %69 : vector<8x128xf32>
    %71 = arith.subf %70, %65 : vector<8x128xf32>
    %72 = vector.broadcast %10 : vector<1x128xf32> to vector<8x128xf32>
    %73 = arith.mulf %71, %72 : vector<8x128xf32>
    %74 = arith.addf %65, %73 : vector<8x128xf32>
    %c7 = arith.constant 7 : index
    %c0_36 = arith.constant 0 : index
    %c0_37 = arith.constant 0 : index
    %75 = vector.load %arg7[%c7, %c0_36, %c0_37] : memref<8x8x128xf32, #tpu.memory_space<vmem>>, vector<1x8x128xf32>
    %76 = vector.shape_cast %75 : vector<1x8x128xf32> to vector<8x128xf32>
    %cst_38 = arith.constant dense<0.000000e+00> : vector<8x128xf32>
    %77 = tpu.matmul %74, %9, %cst_38 {dimension_numbers = #tpu.dot_dimension_numbers<[1], [0], [0], [1], [0, 0, 1, 1], [], []>} : vector<8x128xf32>, vector<128x128xf32>, vector<8x128xf32> -> vector<8x128xf32>
    %78 = arith.addf %76, %77 : vector<8x128xf32>
    %79 = math.tanh %78 : vector<8x128xf32>
    %80 = arith.subf %79, %74 : vector<8x128xf32>
    %81 = vector.broadcast %10 : vector<1x128xf32> to vector<8x128xf32>
    %82 = arith.mulf %80, %81 : vector<8x128xf32>
    %83 = arith.addf %74, %82 : vector<8x128xf32>
    %c0_39 = arith.constant 0 : index
    %c0_40 = arith.constant 0 : index
    %84 = vector.load %arg6[%c0_39, %c0_40] : memref<8x128xf32, #tpu.memory_space<vmem>>, vector<8x128xf32>
    tpu.vector_store %arg6[%c0_39, %c0_40], %83 {strides = array<i32>} : memref<8x128xf32, #tpu.memory_space<vmem>>, vector<8x128xf32>,
    return
  }
  func.func @transform_0(%arg0: i32, %arg1: i32) -> (i32, i32, i32) {
    %c0_i32 = arith.constant 0 : i32
    %c0_i32_0 = arith.constant 0 : i32
    return %arg1, %arg0, %c0_i32 : i32, i32, i32
  }
  func.func @transform_1(%arg0: i32, %arg1: i32) -> (i32, i32) {
    %c0_i32 = arith.constant 0 : i32
    %c0_i32_0 = arith.constant 0 : i32
    %c0_i32_1 = arith.constant 0 : i32
    return %c0_i32, %c0_i32_0 : i32, i32
  }
  func.func @transform_2(%arg0: i32, %arg1: i32) -> (i32, i32) {
    %c0_i32 = arith.constant 0 : i32
    %c0_i32_0 = arith.constant 0 : i32
    %c0_i32_1 = arith.constant 0 : i32
    return %c0_i32, %c0_i32_0 : i32, i32
  }
  func.func @transform_3(%arg0: i32, %arg1: i32) -> (i32, i32) {
    %c0_i32 = arith.constant 0 : i32
    %c0_i32_0 = arith.constant 0 : i32
    %c0_i32_1 = arith.constant 0 : i32
    return %c0_i32, %c0_i32_0 : i32, i32
  }
  func.func @transform_4(%arg0: i32, %arg1: i32) -> (i32, i32) {
    %c0_i32 = arith.constant 0 : i32
    %c0_i32_0 = arith.constant 0 : i32
    return %arg0, %c0_i32 : i32, i32
  }
}

</mosaic_0001>

<bundles_post_ra>
// kernel: tpu_custom_call.1
= control target key start
LH: loop header
LB: loop body
LE: loop exit
PB: predicated region body
PF: predicated region fallthrough
CT: control target
= control target key end

     0   :  { %9 = vsyncpa [#allocation4], 0  ;;  %s1926_s0 = inlined_call_operand.hbm [shape: f32[8,8,16], index: 0, kind: input, shape index: {}]   ;;  %s1927_s1 = inlined_call_operand.hbm [shape: f32[16,128], index: 1, kind: input, shape index: {}]   ;;  %s1928_s2 = inlined_call_operand.hbm [shape: f32[128,128], index: 2, kind: input, shape index: {}]   ;;  %s1929_s3 = inlined_call_operand.vmem [shape: f32[1,128], index: 3, kind: input, shape index: {}]   ;;  %s1930_s4 = inlined_call_operand.hbm [shape: f32[8,128], index: 4, kind: output, shape index: {}]  }
   0x1   :  { %10 = vsyncpa [#allocation7], 0 }
   0x2   :  { %11 = vsyncpa [#allocation5], 0  ;;  %s1634_s15 = smov [#allocation6]   ;;  %s1635_s17 = smov [#allocation3]  }
   0x3   :  { %s29_s16 = sshll.u32 %s1634_s15, 4  ;;  %s17_s18 = sshll.u32 %s1635_s17, 4  ;;  %s30_s16 = int_to_ptr.vmem [resolvable:$true] %s29_s16  ;;  %s1668_s18 = int_to_ptr.vmem [resolvable:$true] %s17_s18 }
   0x4   :  { %s1540_s21 = scalar_lea.hbm %s1927_s1, 256 }
   0x5   :  { %p1541_p0 = scmp.ne.s32.totalorder %s1927_s1, %s1540_s21  ;;  %p1544_p1 = scmp.lt.u32.totalorder %s1540_s21, %s1927_s1 }
   0x7   :  { %p1546_p2 = pnand %p1544_p1, %p1541_p0 }
   0x9   :  { %1549 = shalt.err (!%p1546_p2)
}
   0xa   :  { %s1550_s26 = scalar_lea.vmem %s30_s16, 256  ;;  %p1555_p4 = scmp.lt.s32.totalorder %s30_s16, %s30_s16 }
   0xb   :  { %p1551_p3 = scmp.ne.s32.totalorder %s30_s16, %s1550_s26  ;;  %p1556_p5 = scmp.lt.s32.totalorder %s1550_s26, %s1550_s26 }
   0xd   :  { %p1557_p6 = por %p1556_p5, %p1555_p4 }
   0xf   :  { %p1558_p7 = pnand %p1557_p6, %p1551_p3 }
  0x11   :  { %1561 = shalt.err (!%p1558_p7)
}
  0x12   :  { %s1636_s27 = smov 128   ;;  %s1637_s28 = smov 8  }
  0x13   :  { %35 = dma.hbm_to_vmem [thread:$0]  %s1927_s1, 256, %s30_s16, [#allocation7], %s1636_s27, %s1636_s27, %s1637_s28  }
  0x14   :  { %s1562_s7 = scalar_lea.hbm %s1926_s0, 1024 }
  0x15   :  { %p1563_p8 = scmp.ne.s32.totalorder %s1926_s0, %s1562_s7  ;;  %p1566_p9 = scmp.lt.u32.totalorder %s1562_s7, %s1926_s0 }
  0x17   :  { %p1568_p10 = pnand %p1566_p9, %p1563_p8 }
  0x19   :  { %1571 = shalt.err (!%p1568_p10)
}
  0x1a   :  { %s1572_s12 = scalar_lea.vmem %s1668_s18, 1024  ;;  %p1577_p12 = scmp.lt.s32.totalorder %s1668_s18, %s1668_s18 }
  0x1b   :  { %p1573_p11 = scmp.ne.s32.totalorder %s1668_s18, %s1572_s12  ;;  %p1578_p13 = scmp.lt.s32.totalorder %s1572_s12, %s1572_s12 }
  0x1d   :  { %p1579_p0 = por %p1578_p13, %p1577_p12 }
  0x1f   :  { %p1580_p1 = pnand %p1579_p0, %p1573_p11 }
  0x21   :  { %1583 = shalt.err (!%p1580_p1)
}
  0x22   :  { %23 = dma.hbm_to_vmem [thread:$0]  %s1926_s0, 1024, %s1668_s18, [#allocation4], %s1636_s27, %s1636_s27, %s1637_s28  }
  0x23   :  { %s1638_s14 = smov [#allocation8]   ;;  %s1584_s19 = scalar_lea.hbm %s1928_s2, 2048 }
  0x24   :  { %s41_s15 = sshll.u32 %s1638_s14, 4  ;;  %p1585_p2 = scmp.ne.s32.totalorder %s1928_s2, %s1584_s19  ;;  %s42_s15 = int_to_ptr.vmem [resolvable:$true] %s41_s15 }
  0x25   :  { %p1588_p3 = scmp.lt.u32.totalorder %s1584_s19, %s1928_s2 }
  0x27   :  { %p1590_p4 = pnand %p1588_p3, %p1585_p2 }
  0x29   :  { %1593 = shalt.err (!%p1590_p4)
}
  0x2a   :  { %s1594_s24 = scalar_lea.vmem %s42_s15, 2048  ;;  %p1599_p6 = scmp.lt.s32.totalorder %s42_s15, %s42_s15 }
  0x2b   :  { %p1595_p5 = scmp.ne.s32.totalorder %s42_s15, %s1594_s24  ;;  %p1600_p7 = scmp.lt.s32.totalorder %s1594_s24, %s1594_s24 }
  0x2d   :  { %p1601_p8 = por %p1600_p7, %p1599_p6 }
  0x2f   :  { %p1602_p9 = pnand %p1601_p8, %p1595_p5 }
  0x31   :  { %1605 = shalt.err (!%p1602_p9)
}
  0x32   :  { %47 = dma.hbm_to_vmem [thread:$0]  %s1928_s2, 2048, %s42_s15, [#allocation7], %s1636_s27, %s1636_s27, %s1637_s28  }
  0x33   :  { %1628 = dma.done.wait [#allocation4], 1024  }
  0x34   :  { %1629 = vsyncadd [#allocation4], 4294966272 }
  0x35   :  { %1630 = dma.done.wait [#allocation7], 2304  }
  0x36   :  { %1631 = vsyncadd [#allocation7], 4294964992  ;;  %v1639_v0 = vmov 0.0|0.0   ;;  %vm1640_vm0 = vmmov 0   ;;  %v1641_v1 = vmov 0.0   ;;  %v212_v2 = vld [vmem:[#allocation8] sm:$0xff] }
  0x37   :  { %1323 = vmatprep.subr.bf16.mxu1 %v1639_v0  ;;  %1071 = vmatprep.mubr.msk.f32.mxu1 %vm1640_vm0, %v1641_v1  ;;  %v213_v3 = vld [vmem:[#allocation8 + $0x8] sm:$0xff]  ;;  %v214_v4 = vld [vmem:[#allocation8 + $0x10] sm:$0xff]  ;;  %v215_v6 = vld [vmem:[#allocation8 + $0x18] sm:$0xff]  ;;  %vm74_vm1 = vcmask 130048  }
  0x38   :  { %v1723_v5 = vpack.c.bf16 %v213_v3, %v212_v2  ;;  %v1726_v7 = vpack.c.bf16 %v215_v6, %v214_v4  ;;  %v216_v8 = vld [vmem:[#allocation8 + $0x20] sm:$0xff]  ;;  %v217_v9 = vld [vmem:[#allocation8 + $0x28] sm:$0xff]  ;;  %v72_v10 = vld [vmem:[#allocation6] sm:$0xff] }
  0x39   :  { %v73_v11 = vld [vmem:[#allocation6 + $0x8] sm:$0xff]  ;;  %v64_v12 = vld [vmem:[#allocation3] sm:$0xff]  ;;  %v1731_v14 = vpack.c.bf16 %v217_v9, %v216_v8  ;;  %v220_v19 = vld [vmem:[#allocation8 + $0x40] sm:$0xff] }
  0x3a   :  { %1325 = vmatpush3.bf16.msra.mxu1 %v1723_v5  ;;  %v1319_v13 = vpack.c.bf16 %v73_v11, %v72_v10  ;;  %1027 = vmatprep.mubr.msk.f32.mxu0 %vm74_vm1, %v64_v12  ;;  %v218_v15 = vld [vmem:[#allocation8 + $0x30] sm:$0xff]  ;;  %v219_v16 = vld [vmem:[#allocation8 + $0x38] sm:$0xff]  ;;  %v221_v20 = vld [vmem:[#allocation8 + $0x48] sm:$0xff] }
  0x3b   :  { %1326 = vmatprep.subr.bf16.mxu1 %v1639_v0  ;;  %v65_v17 = vld [vmem:[#allocation3 + $0x8] sm:$0xff]  ;;  %v1736_v18 = vpack.c.bf16 %v219_v16, %v218_v15  ;;  %v1743_v21 = vpack.c.bf16 %v221_v20, %v220_v19  ;;  %v222_v22 = vld [vmem:[#allocation8 + $0x50] sm:$0xff]  ;;  %v224_v25 = vld [vmem:[#allocation8 + $0x60] sm:$0xff] }
  0x3c   :  { %1320 = vmatprep.subr.bf16.mxu0 %v1319_v13  ;;  %v223_v23 = vld [vmem:[#allocation8 + $0x58] sm:$0xff]  ;;  %v225_v26 = vld [vmem:[#allocation8 + $0x68] sm:$0xff]  ;;  %v226_v28 = vld [vmem:[#allocation8 + $0x70] sm:$0xff] }
  0x3d   :  { %1322 = vmatpush3.bf16.msra.mxu0 %v1319_v13  ;;  %v1749_v24 = vpack.c.bf16 %v223_v23, %v222_v22  ;;  %v1755_v27 = vpack.c.bf16 %v225_v26, %v224_v25  ;;  %v227_v29 = vld [vmem:[#allocation8 + $0x78] sm:$0xff]  ;;  %v66_v31 = vld [vmem:[#allocation3 + $0x10] sm:$0xff]  ;;  %v67_v32 = vld [vmem:[#allocation3 + $0x18] sm:$0xff] }
  0x3e   :  { %1328 = vmatpush3.bf16.msra.mxu1 %v1726_v7  ;;  %1347 = vmatprep.subr.bf16.mxu0 %v1639_v0  ;;  %v1761_v30 = vpack.c.bf16 %v227_v29, %v226_v28  ;;  %v68_v33 = vld [vmem:[#allocation3 + $0x20] sm:$0xff]  ;;  %v69_v34 = vld [vmem:[#allocation3 + $0x28] sm:$0xff]  ;;  %v70_v35 = vld [vmem:[#allocation3 + $0x30] sm:$0xff] }
  0x3f   :  { %1329 = vmatprep.subr.bf16.mxu1 %v1639_v0  ;;  %v71_v36 = vld [vmem:[#allocation3 + $0x38] sm:$0xff]  ;;  %v1804_v43 = vld [vmem:[%s1929_s3] ss:$0 sm:$0xff]  ;;  %s1642_s3 = smov [#allocation9]  }
  0x40   :  { %1028 = vmatmul.mubr.msk.f32.vlgmr.msra.gmra.mrb[0].mxu0 %vm74_vm1, %v65_v17  ;;  %s858_s26 = sshll.u32 %s1642_s3, 4  ;;  %s859_s26 = int_to_ptr.vmem [resolvable:$true] %s858_s26 }
  0x41   :  { %1349 = vmatpush3.bf16.msra.mxu0 %v1723_v5  ;;  %1030 = vmatprep.mubr.msk.f32.mxu0 %vm74_vm1, %v66_v31  ;;  %s1606_s27 = scalar_lea.vmem %s859_s26, 128  ;;  %p1611_p11 = scmp.lt.s32.totalorder %s859_s26, %s859_s26 }
  0x42   :  { %1331 = vmatpush3.bf16.msra.mxu1 %v1731_v14  ;;  %1350 = vmatprep.subr.bf16.mxu0 %v1639_v0  ;;  %p1607_p10 = scmp.ne.s32.totalorder %s859_s26, %s1606_s27  ;;  %p1612_p12 = scmp.lt.s32.totalorder %s1606_s27, %s1606_s27 }
  0x43   :  { %1332 = vmatprep.subr.bf16.mxu1 %v1639_v0 }
  0x44   :  { %1031 = vmatmul.mubr.msk.f32.gmra.mrb[2].mxu0 %vm74_vm1, %v67_v32  ;;  %p1613_p13 = por %p1612_p12, %p1611_p11 }
  0x45   :  { %1352 = vmatpush3.bf16.msra.mxu0 %v1726_v7  ;;  %1033 = vmatprep.mubr.msk.f32.mxu0 %vm74_vm1, %v68_v33 }
  0x46   :  { %1334 = vmatpush3.bf16.msra.mxu1 %v1736_v18  ;;  %1353 = vmatprep.subr.bf16.mxu0 %v1639_v0  ;;  %p1614_p0 = pnand %p1613_p13, %p1607_p10 }
  0x47   :  { %1335 = vmatprep.subr.bf16.mxu1 %v1639_v0 }
  0x48   :  { %1034 = vmatmul.mubr.msk.f32.gmra.mrb[4].mxu0 %vm74_vm1, %v69_v34 }
  0x49   :  { %1355 = vmatpush3.bf16.msra.mxu0 %v1731_v14  ;;  %1036 = vmatprep.mubr.msk.f32.mxu0 %vm74_vm1, %v70_v35 }
  0x4a   :  { %1337 = vmatpush3.bf16.msra.mxu1 %v1743_v21  ;;  %1356 = vmatprep.subr.bf16.mxu0 %v1639_v0 }
  0x4b   :  { %1338 = vmatprep.subr.bf16.mxu1 %v1639_v0 }
  0x4c   :  { %1037 = vmatmul.mubr.msk.f32.gmra.mrb[6].mxu0 %vm74_vm1, %v71_v36 }
  0x4d   :  { %1358 = vmatpush3.bf16.msra.mxu0 %v1736_v18  ;;  %1106 = vmatprep.mubr.msk.f32.mxu0 %vm1640_vm0, %v1641_v1 }
  0x4e   :  { %1340 = vmatpush3.bf16.msra.mxu1 %v1749_v24  ;;  %1359 = vmatprep.subr.bf16.mxu0 %v1639_v0 }
  0x4f   :  { %1341 = vmatprep.subr.bf16.mxu1 %v1639_v0 }
  0x51   :  { %1361 = vmatpush3.bf16.msra.mxu0 %v1743_v21 }
  0x52   :  { %1343 = vmatpush3.bf16.msra.mxu1 %v1755_v27  ;;  %1362 = vmatprep.subr.bf16.mxu0 %v1639_v0 }
  0x53   :  { %1344 = vmatprep.subr.bf16.mxu1 %v1639_v0 }
  0x55   :  { %1364 = vmatpush3.bf16.msra.mxu0 %v1749_v24 }
  0x56   :  { %1346 = vmatpush3.bf16.msra.mxu1 %v1761_v30  ;;  %1365 = vmatprep.subr.bf16.mxu0 %v1639_v0 }
  0x57   :  { %1371 = vmatprep.subr.bf16.mxu1 %v1639_v0 }
  0x59   :  { %1072 = vmatmul.mubr.f32.vlgmr.msra.gmra.mrb[0].mxu1 %v1641_v1  ;;  %1367 = vmatpush3.bf16.msra.mxu0 %v1755_v27 }
  0x5a   :  { %1373 = vmatpush3.bf16.msra.mxu1 %v1723_v5  ;;  %1141 = vmatprep.mubr.msk.f32.mxu1 %vm1640_vm0, %v1641_v1 }
  0x5b   :  { %1374 = vmatprep.subr.bf16.mxu1 %v1639_v0  ;;  %1368 = vmatprep.subr.bf16.mxu0 %v1639_v0 }
  0x5d   :  { %1370 = vmatpush3.bf16.msra.mxu0 %v1761_v30 }
  0x5e   :  { %1376 = vmatpush3.bf16.msra.mxu1 %v1726_v7  ;;  %1395 = vmatprep.subr.bf16.mxu0 %v1639_v0 }
  0x5f   :  { %1377 = vmatprep.subr.bf16.mxu1 %v1639_v0 }
  0x62   :  { %1379 = vmatpush3.bf16.msra.mxu1 %v1731_v14 }
  0x63   :  { %1380 = vmatprep.subr.bf16.mxu1 %v1639_v0 }
  0x66   :  { %1382 = vmatpush3.bf16.msra.mxu1 %v1736_v18 }
  0x67   :  { %1383 = vmatprep.subr.bf16.mxu1 %v1639_v0 }
  0x6a   :  { %1385 = vmatpush3.bf16.msra.mxu1 %v1743_v21 }
  0x6b   :  { %1386 = vmatprep.subr.bf16.mxu1 %v1639_v0 }
  0x6e   :  { %1388 = vmatpush3.bf16.msra.mxu1 %v1749_v24 }
  0x6f   :  { %1389 = vmatprep.subr.bf16.mxu1 %v1639_v0 }
  0x72   :  { %1391 = vmatpush3.bf16.msra.mxu1 %v1755_v27 }
  0x73   :  { %1392 = vmatprep.subr.bf16.mxu1 %v1639_v0 }
  0x76   :  { %1394 = vmatpush3.bf16.msra.mxu1 %v1761_v30 }
  0x77   :  { %1419 = vmatprep.subr.bf16.mxu1 %v1639_v0 }
 0x113   :  { %v1029_v37 = vpop.f32.mrb[0].mxu0 }
 0x114   :  { %v165_v38 = vpop.f32.mrb[1].mxu0 }
 0x117   :  { %v1032_v45 = vpop.f32.mrb[2].mxu0 }
 0x118   :  { %v175_v46 = vpop.f32.mrb[3].mxu0 }
 0x11b   :  { %v1825_v47 = vpop.f32.mrb[4].mxu0 }
 0x11c   :  { %v1827_v48 = vpop.f32.mrb[5].mxu0 }
 0x11f   :  { %v1829_v49 = vpop.f32.mrb[6].mxu0 }
 0x120   :  { %v1831_v50 = vpop.f32.mrb[7].mxu0 }
 0x12c   :  { %v297_v39 = vpop.f32.mrb[0].mxu1 }
 0x12d   :  { %v301_v40 = vadd.f32 %v297_v39, %v165_v38  ;;  %v1073_v41 = vpop.f32.mrb[1].mxu1 }
 0x12f   :  { %1524 = vtanh.f32 %v301_v40 }
 0x139   :  { %v1525_v42 = vpop.eup %1524 }
 0x13a   :  { %v310_v44 = vmul.f32 %v1525_v42, %v1804_v43 }
 0x13c   :  { %1107 = vmatmul.mubr.f32.vlgmr.msra.gmra.mrb[8].mxu0 %v310_v44 }
 0x13d   :  { %1397 = vmatpush3.bf16.msra.mxu0 %v1723_v5  ;;  %1176 = vmatprep.mubr.msk.f32.mxu0 %vm1640_vm0, %v1641_v1 }
 0x13e   :  { %1398 = vmatprep.subr.bf16.mxu0 %v1639_v0 }
 0x141   :  { %1400 = vmatpush3.bf16.msra.mxu0 %v1726_v7 }
 0x142   :  { %1401 = vmatprep.subr.bf16.mxu0 %v1639_v0 }
 0x145   :  { %1403 = vmatpush3.bf16.msra.mxu0 %v1731_v14 }
 0x146   :  { %1404 = vmatprep.subr.bf16.mxu0 %v1639_v0 }
 0x149   :  { %1406 = vmatpush3.bf16.msra.mxu0 %v1736_v18 }
 0x14a   :  { %1407 = vmatprep.subr.bf16.mxu0 %v1639_v0 }
 0x14d   :  { %1409 = vmatpush3.bf16.msra.mxu0 %v1743_v21 }
 0x14e   :  { %1410 = vmatprep.subr.bf16.mxu0 %v1639_v0 }
 0x151   :  { %1412 = vmatpush3.bf16.msra.mxu0 %v1749_v24 }
 0x152   :  { %1413 = vmatprep.subr.bf16.mxu0 %v1639_v0 }
 0x155   :  { %1415 = vmatpush3.bf16.msra.mxu0 %v1755_v27 }
 0x156   :  { %1416 = vmatprep.subr.bf16.mxu0 %v1639_v0 }
 0x159   :  { %1418 = vmatpush3.bf16.msra.mxu0 %v1761_v30 }
 0x15a   :  { %1443 = vmatprep.subr.bf16.mxu0 %v1639_v0 }
 0x20f   :  { %v380_v51 = vpop.f32.mrb[8].mxu0 }
 0x210   :  { %v384_v52 = vadd.f32 %v1029_v37, %v380_v51  ;;  %v1108_v53 = vpop.f32.mrb[9].mxu0 }
 0x212   :  { %1526 = vtanh.f32 %v384_v52 }
 0x21c   :  { %v1527_v54 = vpop.eup %1526 }
 0x21d   :  { %v386_v55 = vsub.f32 %v1527_v54, %v310_v44 }
 0x21f   :  { %v387_v56 = vmul.f32 %v1804_v43, %v386_v55 }
 0x221   :  { %v388_v57 = vadd.f32 %v387_v56, %v310_v44 }
 0x223   :  { %1142 = vmatmul.mubr.f32.vlgmr.msra.gmra.mrb[2].mxu1 %v388_v57 }
 0x224   :  { %1421 = vmatpush3.bf16.msra.mxu1 %v1723_v5  ;;  %1211 = vmatprep.mubr.msk.f32.mxu1 %vm1640_vm0, %v1641_v1 }
 0x225   :  { %1422 = vmatprep.subr.bf16.mxu1 %v1639_v0 }
 0x228   :  { %1424 = vmatpush3.bf16.msra.mxu1 %v1726_v7 }
 0x229   :  { %1425 = vmatprep.subr.bf16.mxu1 %v1639_v0 }
 0x22c   :  { %1427 = vmatpush3.bf16.msra.mxu1 %v1731_v14 }
 0x22d   :  { %1428 = vmatprep.subr.bf16.mxu1 %v1639_v0 }
 0x230   :  { %1430 = vmatpush3.bf16.msra.mxu1 %v1736_v18 }
 0x231   :  { %1431 = vmatprep.subr.bf16.mxu1 %v1639_v0 }
 0x234   :  { %1433 = vmatpush3.bf16.msra.mxu1 %v1743_v21 }
 0x235   :  { %1434 = vmatprep.subr.bf16.mxu1 %v1639_v0 }
 0x238   :  { %1436 = vmatpush3.bf16.msra.mxu1 %v1749_v24 }
 0x239   :  { %1437 = vmatprep.subr.bf16.mxu1 %v1639_v0 }
 0x23c   :  { %1439 = vmatpush3.bf16.msra.mxu1 %v1755_v27 }
 0x23d   :  { %1440 = vmatprep.subr.bf16.mxu1 %v1639_v0 }
 0x240   :  { %1442 = vmatpush3.bf16.msra.mxu1 %v1761_v30 }
 0x241   :  { %1467 = vmatprep.subr.bf16.mxu1 %v1639_v0 }
 0x2f6   :  { %v457_v58 = vpop.f32.mrb[2].mxu1 }
 0x2f7   :  { %v461_v59 = vadd.f32 %v457_v58, %v175_v46  ;;  %v1143_v60 = vpop.f32.mrb[3].mxu1 }
 0x2f9   :  { %1528 = vtanh.f32 %v461_v59 }
 0x303   :  { %v1529_v61 = vpop.eup %1528 }
 0x304   :  { %v463_v62 = vsub.f32 %v1529_v61, %v388_v57 }
 0x306   :  { %v464_v63 = vmul.f32 %v1804_v43, %v463_v62 }
 0x308   :  { %v465_v2 = vadd.f32 %v464_v63, %v388_v57 }
 0x30a   :  { %1177 = vmatmul.mubr.f32.vlgmr.msra.gmra.mrb[10].mxu0 %v465_v2 }
 0x30b   :  { %1445 = vmatpush3.bf16.msra.mxu0 %v1723_v5  ;;  %1246 = vmatprep.mubr.msk.f32.mxu0 %vm1640_vm0, %v1641_v1 }
 0x30c   :  { %1446 = vmatprep.subr.bf16.mxu0 %v1639_v0 }
 0x30f   :  { %1448 = vmatpush3.bf16.msra.mxu0 %v1726_v7 }
 0x310   :  { %1449 = vmatprep.subr.bf16.mxu0 %v1639_v0 }
 0x313   :  { %1451 = vmatpush3.bf16.msra.mxu0 %v1731_v14 }
 0x314   :  { %1452 = vmatprep.subr.bf16.mxu0 %v1639_v0 }
 0x317   :  { %1454 = vmatpush3.bf16.msra.mxu0 %v1736_v18 }
 0x318   :  { %1455 = vmatprep.subr.bf16.mxu0 %v1639_v0 }
 0x31b   :  { %1457 = vmatpush3.bf16.msra.mxu0 %v1743_v21 }
 0x31c   :  { %1458 = vmatprep.subr.bf16.mxu0 %v1639_v0 }
 0x31f   :  { %1460 = vmatpush3.bf16.msra.mxu0 %v1749_v24 }
 0x320   :  { %1461 = vmatprep.subr.bf16.mxu0 %v1639_v0 }
 0x323   :  { %1463 = vmatpush3.bf16.msra.mxu0 %v1755_v27 }
 0x324   :  { %1464 = vmatprep.subr.bf16.mxu0 %v1639_v0 }
 0x327   :  { %1466 = vmatpush3.bf16.msra.mxu0 %v1761_v30 }
 0x328   :  { %1491 = vmatprep.subr.bf16.mxu0 %v1639_v0 }
 0x3dd   :  { %v534_v3 = vpop.f32.mrb[10].mxu0 }
 0x3de   :  { %v538_v4 = vadd.f32 %v1032_v45, %v534_v3  ;;  %v1178_v6 = vpop.f32.mrb[11].mxu0 }
 0x3e0   :  { %1530 = vtanh.f32 %v538_v4 }
 0x3ea   :  { %v1531_v8 = vpop.eup %1530 }
 0x3eb   :  { %v540_v9 = vsub.f32 %v1531_v8, %v465_v2 }
 0x3ed   :  { %v541_v10 = vmul.f32 %v1804_v43, %v540_v9 }
 0x3ef   :  { %v542_v11 = vadd.f32 %v541_v10, %v465_v2 }
 0x3f1   :  { %1212 = vmatmul.mubr.f32.vlgmr.msra.gmra.mrb[4].mxu1 %v542_v11 }
 0x3f2   :  { %1469 = vmatpush3.bf16.msra.mxu1 %v1723_v5  ;;  %1281 = vmatprep.mubr.msk.f32.mxu1 %vm1640_vm0, %v1641_v1 }
 0x3f3   :  { %1470 = vmatprep.subr.bf16.mxu1 %v1639_v0 }
 0x3f6   :  { %1472 = vmatpush3.bf16.msra.mxu1 %v1726_v7 }
 0x3f7   :  { %1473 = vmatprep.subr.bf16.mxu1 %v1639_v0 }
 0x3fa   :  { %1475 = vmatpush3.bf16.msra.mxu1 %v1731_v14 }
 0x3fb   :  { %1476 = vmatprep.subr.bf16.mxu1 %v1639_v0 }
 0x3fe   :  { %1478 = vmatpush3.bf16.msra.mxu1 %v1736_v18 }
 0x3ff   :  { %1479 = vmatprep.subr.bf16.mxu1 %v1639_v0 }
 0x402   :  { %1481 = vmatpush3.bf16.msra.mxu1 %v1743_v21 }
 0x403   :  { %1482 = vmatprep.subr.bf16.mxu1 %v1639_v0 }
 0x406   :  { %1484 = vmatpush3.bf16.msra.mxu1 %v1749_v24 }
 0x407   :  { %1485 = vmatprep.subr.bf16.mxu1 %v1639_v0 }
 0x40a   :  { %1487 = vmatpush3.bf16.msra.mxu1 %v1755_v27 }
 0x40b   :  { %1488 = vmatprep.subr.bf16.mxu1 %v1639_v0 }
 0x40e   :  { %1490 = vmatpush3.bf16.msra.mxu1 %v1761_v30 }
 0x4c4   :  { %v611_v12 = vpop.f32.mrb[4].mxu1 }
 0x4c5   :  { %v615_v13 = vadd.f32 %v611_v12, %v1827_v48  ;;  %v1213_v15 = vpop.f32.mrb[5].mxu1 }
 0x4c7   :  { %1532 = vtanh.f32 %v615_v13 }
 0x4d1   :  { %v1533_v16 = vpop.eup %1532 }
 0x4d2   :  { %v617_v17 = vsub.f32 %v1533_v16, %v542_v11 }
 0x4d4   :  { %v618_v19 = vmul.f32 %v1804_v43, %v617_v17 }
 0x4d6   :  { %v619_v20 = vadd.f32 %v618_v19, %v542_v11 }
 0x4d8   :  { %1247 = vmatmul.mubr.f32.vlgmr.msra.gmra.mrb[12].mxu0 %v619_v20 }
 0x4d9   :  { %1493 = vmatpush3.bf16.msra.mxu0 %v1723_v5  ;;  %1316 = vmatprep.mubr.msk.f32.mxu0 %vm1640_vm0, %v1641_v1 }
 0x4da   :  { %1494 = vmatprep.subr.bf16.mxu0 %v1639_v0 }
 0x4dd   :  { %1496 = vmatpush3.bf16.msra.mxu0 %v1726_v7 }
 0x4de   :  { %1497 = vmatprep.subr.bf16.mxu0 %v1639_v0 }
 0x4e1   :  { %1499 = vmatpush3.bf16.msra.mxu0 %v1731_v14 }
 0x4e2   :  { %1500 = vmatprep.subr.bf16.mxu0 %v1639_v0 }
 0x4e5   :  { %1502 = vmatpush3.bf16.msra.mxu0 %v1736_v18 }
 0x4e6   :  { %1503 = vmatprep.subr.bf16.mxu0 %v1639_v0 }
 0x4e9   :  { %1505 = vmatpush3.bf16.msra.mxu0 %v1743_v21 }
 0x4ea   :  { %1506 = vmatprep.subr.bf16.mxu0 %v1639_v0 }
 0x4ed   :  { %1508 = vmatpush3.bf16.msra.mxu0 %v1749_v24 }
 0x4ee   :  { %1509 = vmatprep.subr.bf16.mxu0 %v1639_v0 }
 0x4f1   :  { %1511 = vmatpush3.bf16.msra.mxu0 %v1755_v27 }
 0x4f2   :  { %1512 = vmatprep.subr.bf16.mxu0 %v1639_v0 }
 0x4f5   :  { %1514 = vmatpush3.bf16.msra.mxu0 %v1761_v30 }
 0x5ab   :  { %v688_v1 = vpop.f32.mrb[12].mxu0 }
 0x5ac   :  { %v692_v5 = vadd.f32 %v1825_v47, %v688_v1  ;;  %v1248_v7 = vpop.f32.mrb[13].mxu0 }
 0x5ae   :  { %1534 = vtanh.f32 %v692_v5 }
 0x5b8   :  { %v1535_v14 = vpop.eup %1534 }
 0x5b9   :  { %v694_v18 = vsub.f32 %v1535_v14, %v619_v20 }
 0x5bb   :  { %v695_v21 = vmul.f32 %v1804_v43, %v694_v18 }
 0x5bd   :  { %v696_v22 = vadd.f32 %v695_v21, %v619_v20 }
 0x5bf   :  { %1282 = vmatmul.mubr.f32.vlgmr.msra.gmra.mrb[6].mxu1 %v696_v22 }
 0x692   :  { %v765_v23 = vpop.f32.mrb[6].mxu1 }
 0x693   :  { %v769_v24 = vadd.f32 %v765_v23, %v1831_v50  ;;  %v1283_v25 = vpop.f32.mrb[7].mxu1 }
 0x695   :  { %1536 = vtanh.f32 %v769_v24 }
 0x69f   :  { %v1537_v26 = vpop.eup %1536 }
 0x6a0   :  { %v771_v0 = vsub.f32 %v1537_v26, %v696_v22 }
 0x6a2   :  { %v772_v27 = vmul.f32 %v1804_v43, %v771_v0 }
 0x6a4   :  { %v773_v28 = vadd.f32 %v772_v27, %v696_v22 }
 0x6a6   :  { %1317 = vmatmul.mubr.f32.vlgmr.msra.gmra.mrb[14].mxu0 %v773_v28 }
 0x779   :  { %v842_v29 = vpop.f32.mrb[14].mxu0 }
 0x77a   :  { %v846_v30 = vadd.f32 %v1829_v49, %v842_v29  ;;  %v1318_v31 = vpop.f32.mrb[15].mxu0 }
 0x77c   :  { %1538 = vtanh.f32 %v846_v30 }
 0x786   :  { %v1539_v32 = vpop.eup %1538 }
 0x787   :  { %v848_v33 = vsub.f32 %v1539_v32, %v773_v28 }
 0x789   :  { %v849_v34 = vmul.f32 %v1804_v43, %v848_v33 }
 0x78b   :  { %v850_v35 = vadd.f32 %v849_v34, %v773_v28 }
 0x78d   :  { %851 = vst [vmem:[#allocation9] sm:$0xff] %v850_v35 }
 0x78e   :  { %1617 = shalt.err (!%p1614_p0)
}
 0x78f   :  { %s1618_s30 = scalar_lea.hbm %s1930_s4, 128 }
 0x790   :  { %p1619_p1 = scmp.ne.s32.totalorder %s1930_s4, %s1618_s30  ;;  %p1622_p2 = scmp.lt.u32.totalorder %s1618_s30, %s1930_s4 }
 0x792   :  { %p1624_p3 = pnand %p1622_p2, %p1619_p1 }
 0x794   :  { %1627 = shalt.err (!%p1624_p3)
}
 0x795   :  { %861 = dma.vmem_to_hbm [thread:$0]  %s859_s26, 128, %s1930_s4, [#allocation5]  }
 0x796   :  { %1632 = dma.done.wait [#allocation5], 128  }
 0x797   :  { %1633 = vsyncadd [#allocation5], 4294967168 }
 0x798   :  { %865 = vsyncpa [#allocation4], 1 }
 0x799   :  { %866 = vsyncpa [#allocation7], 1 }
 0x79a   :  { %867 = vsyncpa [#allocation5], 1 }

</bundles_post_ra>
